<compile_context>
chip_gen: v6e
topology: v6e:2x2x1
jax: 0.10.0
libtpu: 0.0.40
codegen_flags: <defaults>
</compile_context>

<pallas_src>
import functools

import jax
import jax.numpy as jnp
from jax.experimental import pallas as pl
from jax.experimental.pallas import tpu as pltpu


def _prompt_kernel(x_ref, tf_ref, tfn2_ref, bd_ref, out_ref, idx_ref, *,
                   pid, temperature, TK):
    """similarity -> temperature power -> softmax -> prompt mix, fully fused."""
    x = x_ref[...]                                   # (B, D)   f32
    tf = tf_ref[...]                                 # (TK, D)  f32
    B = x.shape[0]

    # Shared MXU cross term: x . tf^T -> (B, TK).  HIGHEST keeps a full-f32
    # contraction (protects the Gram decomposition below from cancellation).
    cross = jax.lax.dot_general(
        x, tf, (((1,), (1,)), ((), ())),
        preferred_element_type=jnp.float32,
        precision=jax.lax.Precision.HIGHEST)

    if pid == 0:
        # torch.cdist (p=2) via d^2 = ||x||^2 + ||c||^2 - 2 x.c .
        # ||c||^2 is constant per task -> precomputed in the wrapper.
        x2 = jnp.sum(x * x, axis=-1, keepdims=True)  # (B, 1)
        tf2 = tfn2_ref[...]                          # (1, TK)
        d2 = jnp.maximum(x2 + tf2 - 2.0 * cross, 0.0)
        scores = jnp.sqrt(d2)
    else:
        # einsum('b d, t K d -> b t K') flattened over (t, K).
        scores = cross

    # scores ** temperature (static python float).  temperature == 1 is the
    # identity (matches torch); otherwise matches torch for non-negative
    # scores (negative base with non-integer exponent is NaN in torch too).
    if temperature == 1.0:
        powered = scores
    else:
        powered = jnp.exp(temperature * jnp.log(scores))

    # F.softmax over the flattened (t*K) axis — exact division.
    m = jnp.max(powered, axis=-1, keepdims=True)
    e = jnp.exp(powered - m)
    s = jnp.sum(e, axis=-1, keepdims=True)
    cos = e / s                                      # (B, TK)

    # First-occurrence argmax over the flattened (B, TK) scores as an int32
    # device scalar (the original torch code host-syncs on int(cos.argmax())).
    gmax = jnp.max(jnp.max(cos, axis=1, keepdims=True), axis=0, keepdims=True)
    row = jax.lax.broadcasted_iota(jnp.int32, (B, TK), 0)
    col = jax.lax.broadcasted_iota(jnp.int32, (B, TK), 1)
    rev = (B * TK - 1) - (row * TK + col)            # reversed flat index
    cand = jnp.where(cos == gmax, rev, jnp.int32(-1))
    best_rev = jnp.max(jnp.max(cand, axis=1, keepdims=True),
                       axis=0, keepdims=True)        # (1, 1) int32
    idx_ref[...] = (B * TK - 1) - best_rev           # first flat argmax

    # pa = einsum('b t k, t k e -> b t e') as ONE MXU matmul against the
    # precomputed block-diagonal (TK, T*ED) prompt matrix; result lands
    # directly in lane-dense (B, T*ED) layout (T*ED is a multiple of 128).
    out_ref[...] = jax.lax.dot_general(
        cos, bd_ref[...], (((1,), (0,)), ((), ())),
        preferred_element_type=jnp.float32,
        precision=jax.lax.Precision.HIGHEST)


@functools.partial(jax.jit, static_argnames=("pid", "temperature"))
def prompt_pallas_forward(x_q, tf2d, tf_norm2, bd, *, pid, temperature):
    """x_q: (B, D); tf2d: (T*K, D); tf_norm2: (1, T*K); bd: (T*K, T*ED).

    Returns (pa (B, T*ED) f32, flat argmax index (1, 1) int32).

    All operands total <50 KiB and are fully VMEM-resident on v5e/v6e/v7x.
    For large B, tile the row dimension with a leading "parallel" grid axis
    (dual-TC on v7x) and re-check block sizes against the 32 MiB scoped VMEM
    default (v7x physical VMEM is 64 MiB, half of v5e/v6e).
    """
    B, D = x_q.shape
    TK = tf2d.shape[0]
    TED = bd.shape[1]

    kernel = functools.partial(_prompt_kernel, pid=pid,
                               temperature=float(temperature), TK=TK)

    return pl.pallas_call(
        kernel,
        grid=(1,),
        in_specs=[
            pl.BlockSpec((B, D), lambda i: (0, 0)),
            pl.BlockSpec((TK, D), lambda i: (0, 0)),
            pl.BlockSpec((1, TK), lambda i: (0, 0)),
            pl.BlockSpec((TK, TED), lambda i: (0, 0)),
        ],
        out_specs=(
            pl.BlockSpec((B, TED), lambda i: (0, 0)),
            pl.BlockSpec((1, 1), lambda i: (0, 0)),
        ),
        out_shape=(
            jax.ShapeDtypeStruct((B, TED), jnp.float32),
            jax.ShapeDtypeStruct((1, 1), jnp.int32),
        ),
        compiler_params=pltpu.CompilerParams(
            dimension_semantics=("arbitrary",)),
    )(x_q, tf2d, tf_norm2, bd)


def _block_diag(blocks):
    """blocks: list of T (K, ED) arrays -> (T*K, T*ED) block-diagonal."""
    T = len(blocks)
    rows = []
    for t, blk in enumerate(blocks):
        row = [blk if j == t else jnp.zeros_like(blk) for j in range(T)]
        rows.append(jnp.concatenate(row, axis=1))
    return jnp.concatenate(rows, axis=0)


class Promptv6Pallas:
    """JAX/Pallas port of Promptv6_1_2_3 (forward pass)."""

    def __init__(self, prompt_layers, use_prompt_block, n_tasks=3,
                 prompt_size=(8, 8), prompt_length=(1, 1), key_dim=(128, 128),
                 emb_dim=(64, 64), enable_lora=(False, True, True),
                 temperature=(1.0, 1.0), seed=0):
        self.n_task = n_tasks
        self.prompt_size = list(prompt_size)
        self.prompt_length = list(prompt_length)
        self.key_dim = list(key_dim)
        self.emb_dim = list(emb_dim)
        self.temperature = list(temperature)
        self.prompt_layers = prompt_layers
        self.prompt_block = use_prompt_block
        self.sum_lora = sum(enable_lora)
        self.task_id = 0
        self.current_task_id = None
        self.task_features = None
        self._fwd_cache = {}    # (pid, layer) -> cached device-resident operands

        self.params = {}
        key = jax.random.PRNGKey(seed)
        for t in range(self.n_task):
            for pid in range(len(self.prompt_size)):
                for pi in self.prompt_layers[pid]:
                    for pj in self.prompt_block[pid]:
                        key, k1 = jax.random.split(key)
                        name = f"{t}{pid}{pi}{pj}"
                        # PA: nn.init.uniform_ -> U[0,1);  PB: zeros
                        self.params[f"pa_{name}"] = jax.random.uniform(
                            k1,
                            (self.prompt_size[pid],
                             self.prompt_length[pid] * self.sum_lora,
                             self.emb_dim[pid]),
                            dtype=jnp.float32)
                        self.params[f"pb_{name}"] = jnp.zeros(
                            (self.prompt_length[pid],
                             self.emb_dim[pid] * self.sum_lora),
                            dtype=jnp.float32)

    def process_task_add(self, task_id, key):
        # TODO(synk): original fits sklearn KMeans on features loaded from .npy
        # files; not reproducible in-script.  Use deterministic, L2-normalized
        # synthetic cluster centers (matches the `prepos_feat` normalization).
        self.task_id = task_id
        self.task_features = []
        self._fwd_cache = {}          # invalidate cached per-task constants
        for pid in range(len(self.prompt_size)):
            feats = []
            for _ in range(task_id + 1):
                key, k = jax.random.split(key)
                f = jax.random.normal(
                    k, (self.prompt_size[pid], self.key_dim[pid]), jnp.float32)
                f = f / (jnp.linalg.norm(f, axis=-1, keepdims=True) + 1e-10)
                feats.append(f)
            self.task_features.append(feats)

    def _operands(self, pid, l):
        """Cache per-(pid, layer) constants (stacked features, ||tf||^2, the
        block-diagonal prompt matrix, transposed PB) so per-forward host work
        is just the pallas_call dispatch."""
        ck = (pid, l)
        if ck not in self._fwd_cache:
            n = len(self.task_features[pid])
            tf2d = jnp.concatenate(self.task_features[pid], axis=0)      # (T*K, D)
            tf_norm2 = jnp.sum(tf2d * tf2d, axis=-1, keepdims=True).T    # (1, T*K)
            PA = jnp.stack([self.params[f"pa_{i}{pid}{l}"] for i in range(n)], 0)
            PB = jnp.stack([self.params[f"pb_{i}{pid}{l}"] for i in range(n)], 0)
            T, K, E, De = PA.shape
            bd = _block_diag([PA[t].reshape(K, E * De) for t in range(T)])  # (T*K, T*E*De)
            pb = jnp.swapaxes(PB, -1, -2)[..., None]                     # (T, De*lora, L, 1)
            self._fwd_cache[ck] = (tf2d, tf_norm2, bd, (T, K, E, De), pb)
        return self._fwd_cache[ck]

    def forward(self, x_querry, l: str, pid=0):
        x_q = x_querry[pid]
        tf2d, tf_norm2, bd, (T, K, E, De), pb = self._operands(pid, l)

        pa_out, amax_idx = prompt_pallas_forward(
            x_q, tf2d, tf_norm2, bd,
            pid=pid, temperature=float(self.temperature[pid]))

        if pid == 0:
            # Original: int(cos.argmax() // pool_size) forces a host sync every
            # call; keep it as a device int32 scalar instead.
            self.current_task_id = amax_idx[0, 0] // self.prompt_size[pid]

        B = x_q.shape[0]
        pa = pa_out.reshape(B, T, E, De)     # already emitted in (B, T, ...) layout
        return [pa, pb]


def _reference_forward(x_q, train_features, PA, PB, pid, temperature):
    """Pure-JAX reference mirroring the PyTorch forward (full f32 precision)."""
    if pid == 0:
        diff = x_q[:, None, None, :] - train_features[None, :, :, :]
        cos = jnp.sqrt(jnp.sum(diff * diff, axis=-1))
    else:
        cos = jnp.einsum('bd,tkd->btk', x_q, train_features,
                         precision=jax.lax.Precision.HIGHEST)
    B, T, K = cos.shape
    cosf = cos.reshape(B, -1)
    if temperature != 1.0:
        cosf = cosf ** temperature
    cosf = jax.nn.softmax(cosf, axis=1)
    cos = cosf.reshape(B, T, K)
    pa = jnp.einsum('btk,tked->bted', cos, PA,
                    precision=jax.lax.Precision.HIGHEST)
    pb = jnp.swapaxes(PB, -1, -2)[..., None]
    return pa, pb, cosf


if __name__ == "__main__":
    B, D = 2, 128
    n_tasks, task_id = 3, 2          # 3 tasks "seen" -> T = 3 stacked prompts

    model = Promptv6Pallas(
        prompt_layers=[[0], [0]], use_prompt_block=[[0], [0]],
        n_tasks=n_tasks, prompt_size=[8, 8], prompt_length=[1, 1],
        key_dim=[D, D], emb_dim=[64, 64],
        enable_lora=[False, True, True], temperature=[1.0, 1.0], seed=0)

    key = jax.random.PRNGKey(0)
    key, kf, kq0, kq1 = jax.random.split(key, 4)
    model.process_task_add(task_id=task_id, key=kf)

    x_q0 = jax.random.normal(kq0, (B, D), jnp.float32)
    x_q1 = jax.random.normal(kq1, (B, D), jnp.float32)
    x_q1 = x_q1 / jnp.linalg.norm(x_q1, axis=-1, keepdims=True)
    x_querry = [x_q0, x_q1]

    ok = True
    for pid in (0, 1):
        pa, pb = model.forward(x_querry, l="00", pid=pid)
        pa = jax.block_until_ready(pa)
        pb = jax.block_until_ready(pb)

        tf = jnp.stack(model.task_features[pid], axis=0)
        PA = jnp.stack([model.params[f"pa_{i}{pid}00"]
                        for i in range(task_id + 1)], 0)
        PB = jnp.stack([model.params[f"pb_{i}{pid}00"]
                        for i in range(task_id + 1)], 0)
        pa_ref, pb_ref, cos_ref_flat = _reference_forward(
            x_querry[pid], tf, PA, PB, pid, model.temperature[pid])

        # Exact softmax division + HIGHEST matmul precision -> tight tolerance.
        ok &= bool(jnp.allclose(pa, pa_ref, atol=1e-4, rtol=1e-4))
        ok &= bool(jnp.allclose(pb, pb_ref, atol=1e-6))

        if pid == 0:
            tid_ref = int(jnp.argmax(cos_ref_flat) // model.prompt_size[pid])
            ok &= int(model.current_task_id) == tid_ref

    print("KERNEL_OK" if ok else "KERNEL_MISMATCH")
</pallas_src>

<mosaic_0001>
module attributes {stable_mosaic.version = 11 : i64} {
  func.func @_prompt_kernel(%arg0: i32, %arg1: memref<2x128xf32, #tpu.memory_space<vmem>>, %arg2: memref<24x128xf32, #tpu.memory_space<vmem>>, %arg3: memref<1x24xf32, #tpu.memory_space<vmem>>, %arg4: memref<24x384xf32, #tpu.memory_space<vmem>>, %arg5: memref<2x384xf32, #tpu.memory_space<vmem>>, %arg6: memref<1x1xi32, #tpu.memory_space<vmem>>) attributes {dimension_semantics = [#tpu.dimension_semantics<arbitrary>], iteration_bounds = array<i64: 1>, scalar_prefetch = 0 : i64, scratch_operands = 0 : i64, tpu.core_type = #tpu.core_type<tc>, window_params = [{pipeline_mode = #tpu.pipeline_mode<synchronous>, transform_indices = @transform_0, window_bounds = array<i64: 2, 128>}, {pipeline_mode = #tpu.pipeline_mode<synchronous>, transform_indices = @transform_1, window_bounds = array<i64: 24, 128>}, {pipeline_mode = #tpu.pipeline_mode<synchronous>, transform_indices = @transform_2, window_bounds = array<i64: 1, 24>}, {pipeline_mode = #tpu.pipeline_mode<synchronous>, transform_indices = @transform_3, window_bounds = array<i64: 24, 384>}, {pipeline_mode = #tpu.pipeline_mode<synchronous>, transform_indices = @transform_4, window_bounds = array<i64: 2, 384>}, {pipeline_mode = #tpu.pipeline_mode<synchronous>, transform_indices = @transform_5, window_bounds = array<i64: 1, 1>}]} {
    %c0 = arith.constant 0 : index
    %c0_0 = arith.constant 0 : index
    %0 = vector.load %arg1[%c0, %c0_0] : memref<2x128xf32, #tpu.memory_space<vmem>>, vector<2x128xf32>
    %c0_1 = arith.constant 0 : index
    %c0_2 = arith.constant 0 : index
    %1 = vector.load %arg2[%c0_1, %c0_2] : memref<24x128xf32, #tpu.memory_space<vmem>>, vector<24x128xf32>
    %cst = arith.constant dense<0.000000e+00> : vector<2x24xf32>
    %2 = tpu.matmul %0, %1, %cst {dimension_numbers = #tpu.dot_dimension_numbers<[1], [1], [0], [0], [0, 0, 1, 0], [], []>, precision = #tpu.contract_precision<fp32>} : vector<2x128xf32>, vector<24x128xf32>, vector<2x24xf32> -> vector<2x24xf32>
    %3 = arith.mulf %0, %0 : vector<2x128xf32>
    %cst_3 = arith.constant dense<0.000000e+00> : vector<2xf32>
    %4 = vector.multi_reduction <add>, %3, %cst_3 [1] : vector<2x128xf32> to vector<2xf32>
    %5 = vector.shape_cast %4 : vector<2xf32> to vector<2x1xf32>
    %c0_4 = arith.constant 0 : index
    %c0_5 = arith.constant 0 : index
    %6 = vector.load %arg3[%c0_4, %c0_5] : memref<1x24xf32, #tpu.memory_space<vmem>>, vector<1x24xf32>
    %7 = vector.broadcast %5 : vector<2x1xf32> to vector<2x24xf32>
    %8 = vector.broadcast %6 : vector<1x24xf32> to vector<2x24xf32>
    %9 = arith.addf %7, %8 : vector<2x24xf32>
    %cst_6 = arith.constant 2.000000e+00 : f32
    %10 = vector.broadcast %cst_6 : f32 to vector<2x24xf32>
    %11 = arith.mulf %10, %2 : vector<2x24xf32>
    %12 = arith.subf %9, %11 : vector<2x24xf32>
    %cst_7 = arith.constant 0.000000e+00 : f32
    %13 = vector.broadcast %cst_7 : f32 to vector<2x24xf32>
    %14 = arith.maximumf %12, %13 : vector<2x24xf32>
    %15 = math.sqrt %14 : vector<2x24xf32>
    %cst_8 = arith.constant dense<0xFF800000> : vector<2xf32>
    %16 = vector.multi_reduction <maximumf>, %15, %cst_8 [1] : vector<2x24xf32> to vector<2xf32>
    %17 = vector.shape_cast %16 : vector<2xf32> to vector<2x1xf32>
    %18 = vector.broadcast %17 : vector<2x1xf32> to vector<2x24xf32>
    %19 = arith.subf %15, %18 : vector<2x24xf32>
    %20 = math.exp %19 : vector<2x24xf32>
    %cst_9 = arith.constant dense<0.000000e+00> : vector<2xf32>
    %21 = vector.multi_reduction <add>, %20, %cst_9 [1] : vector<2x24xf32> to vector<2xf32>
    %22 = vector.shape_cast %21 : vector<2xf32> to vector<2x1xf32>
    %23 = vector.broadcast %22 : vector<2x1xf32> to vector<2x24xf32>
    %24 = arith.divf %20, %23 : vector<2x24xf32>
    %cst_10 = arith.constant dense<0xFF800000> : vector<2xf32>
    %25 = vector.multi_reduction <maximumf>, %24, %cst_10 [1] : vector<2x24xf32> to vector<2xf32>
    %26 = vector.shape_cast %25 : vector<2xf32> to vector<2x1xf32>
    %cst_11 = arith.constant dense<0xFF800000> : vector<1xf32>
    %27 = vector.multi_reduction <maximumf>, %26, %cst_11 [0] : vector<2x1xf32> to vector<1xf32>
    %28 = vector.shape_cast %27 : vector<1xf32> to vector<1x1xf32>
    %29 = tpu.iota {dimensions = array<i32: 0>} : vector<2x24xi32>
    %30 = tpu.iota {dimensions = array<i32: 1>} : vector<2x24xi32>
    %c24_i32 = arith.constant 24 : i32
    %31 = vector.broadcast %c24_i32 : i32 to vector<2x24xi32>
    %32 = arith.muli %29, %31 : vector<2x24xi32>
    %33 = arith.addi %32, %30 : vector<2x24xi32>
    %c47_i32 = arith.constant 47 : i32
    %34 = vector.broadcast %c47_i32 : i32 to vector<2x24xi32>
    %35 = arith.subi %34, %33 : vector<2x24xi32>
    %36 = vector.broadcast %28 : vector<1x1xf32> to vector<2x24xf32>
    %37 = arith.cmpf oeq, %24, %36 : vector<2x24xf32>
    %c-1_i32 = arith.constant -1 : i32
    %38 = vector.broadcast %c-1_i32 : i32 to vector<2x24xi32>
    %39 = arith.select %37, %35, %38 : vector<2x24xi1>, vector<2x24xi32>
    %cst_12 = arith.constant dense<-2147483648> : vector<2xi32>
    %40 = vector.multi_reduction <maxsi>, %39, %cst_12 [1] : vector<2x24xi32> to vector<2xi32>
    %41 = vector.shape_cast %40 : vector<2xi32> to vector<2x1xi32>
    %cst_13 = arith.constant dense<-2147483648> : vector<1xi32>
    %42 = vector.multi_reduction <maxsi>, %41, %cst_13 [0] : vector<2x1xi32> to vector<1xi32>
    %43 = vector.shape_cast %42 : vector<1xi32> to vector<1x1xi32>
    %c47_i32_14 = arith.constant 47 : i32
    %44 = vector.broadcast %c47_i32_14 : i32 to vector<1x1xi32>
    %45 = arith.subi %44, %43 : vector<1x1xi32>
    %c0_15 = arith.constant 0 : index
    %c0_16 = arith.constant 0 : index
    %46 = vector.load %arg6[%c0_15, %c0_16] : memref<1x1xi32, #tpu.memory_space<vmem>>, vector<1x1xi32>
    tpu.vector_store %arg6[%c0_15, %c0_16], %45 {strides = array<i32>} : memref<1x1xi32, #tpu.memory_space<vmem>>, vector<1x1xi32>,
    %c0_17 = arith.constant 0 : index
    %c0_18 = arith.constant 0 : index
    %47 = vector.load %arg4[%c0_17, %c0_18] : memref<24x384xf32, #tpu.memory_space<vmem>>, vector<24x384xf32>
    %cst_19 = arith.constant dense<0.000000e+00> : vector<2x384xf32>
    %48 = tpu.matmul %24, %47, %cst_19 {dimension_numbers = #tpu.dot_dimension_numbers<[1], [0], [0], [1], [0, 0, 1, 1], [], []>, precision = #tpu.contract_precision<fp32>} : vector<2x24xf32>, vector<24x384xf32>, vector<2x384xf32> -> vector<2x384xf32>
    %c0_20 = arith.constant 0 : index
    %c0_21 = arith.constant 0 : index
    %49 = vector.load %arg5[%c0_20, %c0_21] : memref<2x384xf32, #tpu.memory_space<vmem>>, vector<2x384xf32>
    tpu.vector_store %arg5[%c0_20, %c0_21], %48 {strides = array<i32>} : memref<2x384xf32, #tpu.memory_space<vmem>>, vector<2x384xf32>,
    return
  }
  func.func @transform_0(%arg0: i32) -> (i32, i32) {
    %c0_i32 = arith.constant 0 : i32
    %c0_i32_0 = arith.constant 0 : i32
    %c0_i32_1 = arith.constant 0 : i32
    return %c0_i32, %c0_i32_0 : i32, i32
  }
  func.func @transform_1(%arg0: i32) -> (i32, i32) {
    %c0_i32 = arith.constant 0 : i32
    %c0_i32_0 = arith.constant 0 : i32
    %c0_i32_1 = arith.constant 0 : i32
    return %c0_i32, %c0_i32_0 : i32, i32
  }
  func.func @transform_2(%arg0: i32) -> (i32, i32) {
    %c0_i32 = arith.constant 0 : i32
    %c0_i32_0 = arith.constant 0 : i32
    %c0_i32_1 = arith.constant 0 : i32
    return %c0_i32, %c0_i32_0 : i32, i32
  }
  func.func @transform_3(%arg0: i32) -> (i32, i32) {
    %c0_i32 = arith.constant 0 : i32
    %c0_i32_0 = arith.constant 0 : i32
    %c0_i32_1 = arith.constant 0 : i32
    return %c0_i32, %c0_i32_0 : i32, i32
  }
  func.func @transform_4(%arg0: i32) -> (i32, i32) {
    %c0_i32 = arith.constant 0 : i32
    %c0_i32_0 = arith.constant 0 : i32
    %c0_i32_1 = arith.constant 0 : i32
    return %c0_i32, %c0_i32_0 : i32, i32
  }
  func.func @transform_5(%arg0: i32) -> (i32, i32) {
    %c0_i32 = arith.constant 0 : i32
    %c0_i32_0 = arith.constant 0 : i32
    %c0_i32_1 = arith.constant 0 : i32
    return %c0_i32, %c0_i32_0 : i32, i32
  }
}

</mosaic_0001>

<bundles_post_ra>
// kernel: prompt_pallas_forward.1
= control target key start
LH: loop header
LB: loop body
LE: loop exit
PB: predicated region body
PF: predicated region fallthrough
CT: control target
= control target key end

     0   :  { %11 = vsyncpa [#allocation3], 0  ;;  %s2260_s0 = inlined_call_operand.hbm [shape: f32[2,128], index: 0, kind: input, shape index: {}]   ;;  %s2261_s1 = inlined_call_operand.hbm [shape: f32[24,128], index: 1, kind: input, shape index: {}]   ;;  %s2262_s2 = inlined_call_operand.vmem [shape: f32[1,24], index: 2, kind: input, shape index: {}]   ;;  %s2263_s3 = inlined_call_operand.hbm [shape: f32[24,384], index: 3, kind: input, shape index: {}]   ;;  %s2264_s4 = inlined_call_operand.hbm [shape: f32[2,384], index: 4, kind: output, shape index: {0}]   ;;  %s2265_s5 = inlined_call_operand.hbm [shape: s32[1,1], index: 5, kind: output, shape index: {1}]  }
   0x1   :  { %12 = vsyncpa [#allocation6], 0 }
   0x2   :  { %13 = vsyncpa [#allocation4], 0 }
   0x3   :  { %14 = vsyncpa [#allocation10], 0  ;;  %s1954_s18 = smov [#allocation5]  }
   0x4   :  { %s30_s19 = sshll.u32 %s1954_s18, 4  ;;  %s31_s19 = int_to_ptr.vmem [resolvable:$true] %s30_s19 }
   0x5   :  { %s1854_s20 = scalar_lea.vmem %s31_s19, 384  ;;  %p1859_p1 = scmp.lt.s32.totalorder %s31_s19, %s31_s19 }
   0x6   :  { %p1855_p0 = scmp.ne.s32.totalorder %s31_s19, %s1854_s20  ;;  %p1860_p2 = scmp.lt.s32.totalorder %s1854_s20, %s1854_s20 }
   0x8   :  { %p1861_p3 = por %p1860_p2, %p1859_p1 }
   0xa   :  { %p1862_p4 = pnand %p1861_p3, %p1855_p0 }
   0xc   :  { %1865 = shalt.err (!%p1862_p4)
}
   0xd   :  { %s1955_s21 = smov 128   ;;  %s1956_s22 = smov 8  }
   0xe   :  { %36 = dma.hbm_to_vmem [thread:$0]  %s2261_s1, 384, %s31_s19, [#allocation6], %s1955_s21, %s1955_s21, %s1956_s22  }
   0xf   :  { %s1957_s25 = smov [#allocation2]   ;;  %s1958_s27 = smov [#allocation7]  }
  0x10   :  { %s21_s26 = sshll.u32 %s1957_s25, 4  ;;  %s44_s28 = sshll.u32 %s1958_s27, 4  ;;  %s22_s26 = int_to_ptr.vmem [resolvable:$true] %s21_s26  ;;  %s45_s28 = int_to_ptr.vmem [resolvable:$true] %s44_s28 }
  0x11   :  { %s1874_s29 = scalar_lea.vmem %s22_s26, 32  ;;  %p1879_p6 = scmp.lt.s32.totalorder %s22_s26, %s22_s26 }
  0x12   :  { %p1875_p5 = scmp.ne.s32.totalorder %s22_s26, %s1874_s29  ;;  %p1880_p7 = scmp.lt.s32.totalorder %s1874_s29, %s1874_s29 }
  0x14   :  { %p1881_p8 = por %p1880_p7, %p1879_p6 }
  0x16   :  { %p1882_p9 = pnand %p1881_p8, %p1875_p5 }
  0x18   :  { %1885 = shalt.err (!%p1882_p9)
}
  0x19   :  { %24 = dma.hbm_to_vmem [thread:$0]  %s2260_s0, 32, %s22_s26, [#allocation3]  }
  0x1a   :  { %s1894_s7 = scalar_lea.vmem %s45_s28, 1152  ;;  %p1899_p11 = scmp.lt.s32.totalorder %s45_s28, %s45_s28 }
  0x1b   :  { %p1895_p10 = scmp.ne.s32.totalorder %s45_s28, %s1894_s7  ;;  %p1900_p12 = scmp.lt.s32.totalorder %s1894_s7, %s1894_s7 }
  0x1d   :  { %p1901_p13 = por %p1900_p12, %p1899_p11 }
  0x1f   :  { %p1902_p0 = pnand %p1901_p13, %p1895_p10 }
  0x21   :  { %1905 = shalt.err (!%p1902_p0)
}
  0x22   :  { %s1959_s1 = smov 384   ;;  %s1960_s8 = smov 24  }
  0x23   :  { %50 = dma.hbm_to_vmem [thread:$0]  %s2263_s3, 1152, %s45_s28, [#allocation6], %s1959_s1, %s1959_s1, %s1960_s8  }
  0x24   :  { %1946 = dma.done.wait [#allocation3], 32  }
  0x25   :  { %1947 = vsyncadd [#allocation3], 4294967264 }
  0x26   :  { %1948 = dma.done.wait [#allocation6], 1536  }
  0x27   :  { %1949 = vsyncadd [#allocation6], 4294965760  ;;  %v1961_v0 = vmov 0.0   ;;  %vm1962_vm0 = vmmov 0   ;;  %v63_v1 = vld [vmem:[#allocation5 + $0x10] sm:$0xff]  ;;  %v62_v2 = vld [vmem:[#allocation5 + $0x8] sm:$0xff] }
  0x28   :  { %1720 = vmatprep.subr.mxu0 %v1961_v0  ;;  %1729 = vmatprep.subr.mxu1 %v1961_v0  ;;  %v61_v3 = vld [vmem:[#allocation5] sm:$0xff]  ;;  %v91_v4 = vand.u32 4294901760, %v63_v1  ;;  %v2011_v5 = vand.u32 4294901760, %v62_v2  ;;  %v60_v7 = vld [vmem:[#allocation2] sm:$0x3]  ;;  %vm537_vm1 = vcmask 1041408  }
  0x29   :  { %1726 = vmatprep.mubr.msk.f32.mxu0 %vm1962_vm0, %v1961_v0  ;;  %1735 = vmatprep.mubr.msk.f32.mxu1 %vm1962_vm0, %v1961_v0  ;;  %v2013_v6 = vand.u32 4294901760, %v61_v3  ;;  %v2015_v8 = vand.u32 4294901760, %v60_v7  ;;  %v536_v9 = vmul.f32 %v60_v7, %v60_v7  ;;  %v1671_v40 = vld [vmem:[%s2262_s2] ss:$0 sm:$0xff]  ;;  %vm559_vm3 = vcmask 189440   ;;  %v625_v61 = vld [vmem:[#allocation7 + $0x38] sm:$0xff] }
  0x2a   :  { %1721 = vmatpush3.xpose.msra.mxu0 %v91_v4  ;;  %v170_v10 = vsub.f32 %v63_v1, %v91_v4  ;;  %v177_v11 = vsub.f32 %v62_v2, %v2011_v5  ;;  %v624_v62 = vld [vmem:[#allocation7 + $0x30] sm:$0xff]  ;;  %v622_v63 = vld [vmem:[#allocation7 + $0x20] sm:$0xff]  ;;  %v2061_v1 = vand.u32 4294901760, %v625_v61  ;;  %vm627_vm5 = vcmask 195584   ;;  %s1964_s2 = smov [#allocation8]  }
  0x2b   :  { %v184_v12 = vsub.f32 %v61_v3, %v2013_v6  ;;  %1722 = vmatprep.subr.mxu0 %v1961_v0  ;;  %v133_v13 = vsub.f32 %v60_v7, %v2015_v8  ;;  %v538_v14 = vsel %vm537_vm1, %v536_v9, 0.0  ;;  %v2063_v2 = vand.u32 4294901760, %v624_v62  ;;  %s1647_s11 = sshll.u32 %s1964_s2, 4  ;;  %s1648_s11 = int_to_ptr.vmem [resolvable:$true] %s1647_s11 }
  0x2c   :  { %v171_v15 = vand.u32 4294901760, %v170_v10  ;;  %v178_v16 = vand.u32 4294901760, %v177_v11  ;;  %539 = vadd.xlane.f32.xlu0 %v538_v14  ;;  %v2065_v3 = vand.u32 4294901760, %v622_v63  ;;  %s1906_s12 = scalar_lea.vmem %s1648_s11, 96  ;;  %p1911_p2 = scmp.lt.s32.totalorder %s1648_s11, %s1648_s11 }
  0x2d   :  { %v134_v17 = vand.u32 4294901760, %v133_v13  ;;  %v185_v20 = vand.u32 4294901760, %v184_v12  ;;  %p1907_p1 = scmp.ne.s32.totalorder %s1648_s11, %s1906_s12  ;;  %p1912_p3 = scmp.lt.s32.totalorder %s1906_s12, %s1906_s12 }
  0x2e   :  { %1723 = vmatpush3.xpose.msra.mxu0 %v2011_v5  ;;  %v172_v18 = vsub.f32 %v170_v10, %v171_v15  ;;  %v179_v19 = vsub.f32 %v177_v11, %v178_v16 }
  0x2f   :  { %1724 = vmatprep.subr.mxu0 %v1961_v0  ;;  %v135_v21 = vsub.f32 %v133_v13, %v134_v17  ;;  %v186_v25 = vsub.f32 %v184_v12, %v185_v20  ;;  %p1913_p4 = por %p1912_p3, %p1911_p2 }
  0x30   :  { %v173_v22 = vand.u32 4294901760, %v172_v18  ;;  %v180_v24 = vand.u32 4294901760, %v179_v19 }
  0x31   :  { %v136_v23 = vand.u32 4294901760, %v135_v21  ;;  %v187_v26 = vand.u32 4294901760, %v186_v25  ;;  %p1914_p5 = pnand %p1913_p4, %p1907_p1 }
  0x32   :  { %1725 = vmatpush3.xpose.msra.mxu0 %v2013_v6  ;;  %1730 = vmatpush3.xpose.msra.mxu1 %v173_v22 }
  0x33   :  { %1731 = vmatprep.subr.mxu1 %v1961_v0  ;;  %1738 = vmatprep.subr.mxu0 %v1961_v0 }
  0x35   :  { %1727 = vmatmul.mubr.f32.vlgmr.msra.gmra.mxu0 %v136_v23 }
  0x36   :  { %1732 = vmatpush3.xpose.msra.mxu1 %v180_v24  ;;  %1739 = vmatpush3.xpose.msra.mxu0 %v170_v10  ;;  %v2074_v10 = vsub.f32 %v625_v61, %v2061_v1 }
  0x37   :  { %1733 = vmatprep.subr.mxu1 %v1961_v0  ;;  %1740 = vmatprep.subr.mxu0 %v1961_v0 }
  0x38   :  { %1744 = vmatprep.mubr.msk.f32.mxu0 %vm1962_vm0, %v1961_v0 }
  0x3a   :  { %1734 = vmatpush3.xpose.msra.mxu1 %v187_v26  ;;  %1741 = vmatpush3.xpose.msra.mxu0 %v177_v11  ;;  %v2077_v11 = vsub.f32 %v624_v62, %v2063_v2  ;;  %v581_v62 = vlaneseq }
  0x3b   :  { %1742 = vmatprep.subr.mxu0 %v1961_v0  ;;  %1747 = vmatprep.subr.mxu1 %v1961_v0 }
  0x3d   :  { %1736 = vmatmul.mubr.f32.vlgmr.msra.gmra.mxu1 %v2015_v8 }
  0x3e   :  { %1743 = vmatpush3.xpose.msra.mxu0 %v184_v12  ;;  %1748 = vmatpush3.xpose.msra.mxu1 %v91_v4  ;;  %v2080_v12 = vsub.f32 %v622_v63, %v2065_v3  ;;  %v582_v63 = vshrl.u32 %v581_v62, 7 }
  0x3f   :  { %1749 = vmatprep.subr.mxu1 %v1961_v0  ;;  %1756 = vmatprep.subr.mxu0 %v1961_v0 }
  0x40   :  { %1753 = vmatprep.mubr.msk.f32.mxu1 %vm1962_vm0, %v1961_v0  ;;  %v753_v18 = vand.u32 4294901760, %v2080_v12 }
  0x41   :  { %1745 = vmatmul.mubr.f32.vlgmr.msra.gmra.mxu0 %v133_v13 }
  0x42   :  { %1750 = vmatpush3.xpose.msra.mxu1 %v2011_v5  ;;  %1757 = vmatpush3.xpose.msra.mxu0 %v171_v15  ;;  %v754_v24 = vsub.f32 %v2080_v12, %v753_v18 }
  0x43   :  { %1751 = vmatprep.subr.mxu1 %v1961_v0  ;;  %1758 = vmatprep.subr.mxu0 %v1961_v0 }
  0x44   :  { %1762 = vmatprep.mubr.msk.f32.mxu0 %vm1962_vm0, %v1961_v0 }
  0x46   :  { %1752 = vmatpush3.xpose.msra.mxu1 %v2013_v6  ;;  %1759 = vmatpush3.xpose.msra.mxu0 %v178_v16  ;;  %v741_v16 = vand.u32 4294901760, %v2074_v10 }
  0x47   :  { %1760 = vmatprep.subr.mxu0 %v1961_v0  ;;  %1765 = vmatprep.subr.mxu1 %v1961_v0 }
  0x48   :  { %v742_v22 = vsub.f32 %v2074_v10, %v741_v16 }
  0x49   :  { %1754 = vmatmul.mubr.f32.vlgmr.msra.gmra.mxu1 %v134_v17  ;;  %v747_v17 = vand.u32 4294901760, %v2077_v11 }
  0x4a   :  { %1761 = vmatpush3.xpose.msra.mxu0 %v185_v20  ;;  %1766 = vmatpush3.xpose.msra.mxu1 %v91_v4  ;;  %v621_v4 = vld [vmem:[#allocation7 + $0x18] sm:$0xff] }
  0x4b   :  { %1767 = vmatprep.subr.mxu1 %v1961_v0  ;;  %1771 = vmatprep.mubr.msk.f32.mxu1 %vm1962_vm0, %v1961_v0  ;;  %v2067_v7 = vand.u32 4294901760, %v621_v4  ;;  %v748_v23 = vsub.f32 %v2077_v11, %v747_v17 }
  0x4c   :  { %658 = vmatprep.subr.mxu0 %v2061_v1 }
  0x4d   :  { %1763 = vmatmul.mubr.f32.vlgmr.msra.gmra.mxu0 %v2015_v8  ;;  %v2084_v13 = vsub.f32 %v621_v4, %v2067_v7  ;;  %v584_v4 = vand.u32 127, %v581_v62 }
  0x4e   :  { %1768 = vmatpush3.xpose.msra.mxu1 %v2011_v5  ;;  %701 = vmatprep.mubr.f32.mxu0 %v1961_v0  ;;  %v619_v5 = vld [vmem:[#allocation7 + $0x8] sm:$0xff] }
  0x4f   :  { %1769 = vmatprep.subr.mxu1 %v1961_v0  ;;  %660 = vmatpush1.msra.mxu0 %v2063_v2  ;;  %v759_v19 = vand.u32 4294901760, %v2084_v13 }
  0x50   :  { %662 = vmatprep.subr.mxu0 %v2065_v3 }
  0x51   :  { %664 = vmatpush1.msra.mxu0 %v2067_v7  ;;  %v760_v25 = vsub.f32 %v2084_v13, %v759_v19 }
  0x52   :  { %1770 = vmatpush3.xpose.msra.mxu1 %v2013_v6  ;;  %v618_v6 = vld [vmem:[#allocation7] sm:$0xff] }
  0x53   :  { %v2071_v9 = vand.u32 4294901760, %v618_v6 }
  0x55   :  { %1772 = vmatmul.mubr.f32.vlgmr.msra.gmra.mxu1 %v2015_v8  ;;  %v2069_v8 = vand.u32 4294901760, %v619_v5  ;;  %v2090_v15 = vsub.f32 %v618_v6, %v2071_v9 }
  0x56   :  { %807 = vmatprep.mubr.f32.mxu1 %v1961_v0 }
  0x57   :  { %v2087_v14 = vsub.f32 %v619_v5, %v2069_v8  ;;  %v771_v21 = vand.u32 4294901760, %v2090_v15  ;;  %666 = vmatprep.subr.mxu0 %v2069_v8  ;;  %v585_v5 = vmul.u32 24, %v582_v63 }
  0x58   :  { %668 = vmatpush1.msra.mxu0 %v2071_v9 }
  0x59   :  { %v765_v20 = vand.u32 4294901760, %v2087_v14  ;;  %843 = vmatprep.subr.mxu0 %v2074_v10 }
  0x5b   :  { %v766_v26 = vsub.f32 %v2087_v14, %v765_v20 }
  0xb5   :  { %v540_v41 = vpop.xlane.xlu0 %539 }
  0xb6   :  { %v548_v45 = vadd.f32 %v1671_v40, %v540_v41  ;;  %v620_v40 = vld [vmem:[#allocation7 + $0x10] sm:$0xff] }
  0xf5   :  { %v138_v27 = vpop.f32.mrf.mxu0 }
  0xf7   :  { %v1728_v28 = vpop.f32.mrf.mxu0 }
  0xf8   :  { %v743_v28 = vand.u32 4294901760, %v742_v22 }
  0xfa   :  { %744 = vmatprep.subr.mxu1 %v743_v28 }
  0xfd   :  { %v224_v29 = vpop.f32.mrf.mxu1 }
  0xfe   :  { %v225_v36 = vadd.f32 %v224_v29, %v138_v27  ;;  %v772_v27 = vsub.f32 %v2090_v15, %v771_v21  ;;  %v749_v29 = vand.u32 4294901760, %v748_v23 }
  0xff   :  { %v1737_v30 = vpop.f32.mrf.mxu1 }
 0x100   :  { %v755_v30 = vand.u32 4294901760, %v754_v24  ;;  %750 = vmatpush1.msra.mxu1 %v749_v29 }
 0x101   :  { %v302_v31 = vpop.f32.mrf.mxu0 }
 0x102   :  { %v303_v38 = vadd.f32 %v302_v31, %v225_v36  ;;  %v761_v31 = vand.u32 4294901760, %v760_v25  ;;  %756 = vmatprep.subr.mxu1 %v755_v30 }
 0x103   :  { %v1746_v32 = vpop.f32.mrf.mxu0 }
 0x104   :  { %v767_v32 = vand.u32 4294901760, %v766_v26  ;;  %762 = vmatpush1.msra.mxu1 %v761_v31 }
 0x106   :  { %768 = vmatprep.subr.mxu1 %v767_v32 }
 0x109   :  { %v378_v33 = vpop.f32.mrf.mxu1 }
 0x10a   :  { %v379_v39 = vadd.f32 %v378_v33, %v303_v38  ;;  %v773_v33 = vand.u32 4294901760, %v772_v27  ;;  %v623_v38 = vld [vmem:[#allocation7 + $0x28] sm:$0xff] }
 0x10b   :  { %v1755_v34 = vpop.f32.mrf.mxu1 }
 0x10c   :  { %774 = vmatpush1.msra.mxu1 %v773_v33 }
 0x10d   :  { %v458_v35 = vpop.f32.mrf.mxu0  ;;  %927 = vmatprep.subr.mxu1 %v2061_v1 }
 0x10e   :  { %v459_v42 = vadd.f32 %v458_v35, %v379_v39  ;;  %v626_v35 = vld [vmem:[#allocation7 + $0x40] sm:$0xff] }
 0x10f   :  { %v1764_v37 = vpop.f32.mrf.mxu0 }
 0x110   :  { %v2123_v37 = vand.u32 4294901760, %v626_v35 }
 0x115   :  { %v532_v43 = vpop.f32.mrf.mxu1 }
 0x116   :  { %v533_v44 = vadd.f32 %v532_v43, %v459_v42  ;;  %v2130_v43 = vand.u32 4294901760, %v623_v38 }
 0x117   :  { %v1773_v46 = vpop.f32.mrf.mxu1 }
 0x118   :  { %v549_v47 = vmul.f32 2.0, %v533_v44  ;;  %v2137_v46 = vand.u32 4294901760, %v620_v40 }
 0x11a   :  { %v550_v48 = vsub.f32 %v548_v45, %v549_v47  ;;  %v2135_v45 = vsub.f32 %v626_v35, %v2123_v37 }
 0x11c   :  { %v551_v49 = vmax.f32 %v550_v48, 0.0  ;;  %v2146_v48 = vsub.f32 %v623_v38, %v2130_v43 }
 0x11e   :  { %1840 = vrsqrt.f32 %v551_v49  ;;  %vm554_vm2 = vcmp.eq.f32.partialorder %v551_v49, inf  ;;  %v557_v52 = vand.u32 2147483648, %v551_v49  ;;  %vm556_vm4 = vcmp.eq.f32.partialorder %v551_v49, 0.0 }
 0x12b   :  { %v1841_v50 = vpop.eup %1840 }
 0x12c   :  { %v553_v51 = vmul.f32 %v1841_v50, %v551_v49  ;;  %v1255_v50 = vand.u32 4294901760, %v2135_v45 }
 0x12e   :  { %v555_v53 = vsel %vm554_vm2, %v551_v49, %v553_v51  ;;  %v2153_v51 = vsub.f32 %v620_v40, %v2137_v46 }
 0x12f   :  { %v558_v54 = vsel %vm556_vm4, %v557_v52, %v555_v53  ;;  %v1262_v53 = vand.u32 4294901760, %v2146_v48 }
 0x130   :  { %v560_v55 = vsel %vm559_vm3, %v558_v54, -inf }
 0x131   :  { %561 = vmax.xlane.f32.xlu0 %v560_v55  ;;  %v1256_v55 = vsub.f32 %v2135_v45, %v1255_v50 }
 0x1ba   :  { %v562_v56 = vpop.xlane.xlu0 %561 }
 0x1bb   :  { %v563_v57 = vsub.f32 %v558_v54, %v562_v56  ;;  %v1269_v56 = vand.u32 4294901760, %v2153_v51 }
 0x1bd   :  { %v564_v58 = vmul.f32 1.442695, %v563_v57  ;;  %v1263_v57 = vsub.f32 %v2146_v48, %v1262_v53 }
 0x1bf   :  { %1842 = vpow2.f32 %v564_v58  ;;  %v1257_v58 = vand.u32 4294901760, %v1256_v55 }
 0x1cc   :  { %v1843_v59 = vpop.eup %1842 }
 0x1cd   :  { %v566_v60 = vsel %vm559_vm3, %v1843_v59, 0.0 }
 0x1ce   :  { %567 = vadd.xlane.f32.xlu1 %v566_v60  ;;  %v1264_v60 = vand.u32 4294901760, %v1263_v57 }
 0x257   :  { %v568_v34 = vpop.xlane.xlu1 %567 }
 0x258   :  { %1844 = vrcp.f32 %v568_v34 }
 0x265   :  { %v1845_v36 = vpop.eup %1844 }
 0x266   :  { %v2125_v39 = vmul.f32 %v1845_v36, %v1843_v59  ;;  %v1270_v59 = vsub.f32 %v2153_v51, %v1269_v56 }
 0x268   :  { %v571_v41 = vsel %vm559_vm3, %v2125_v39, -inf  ;;  %v629_v42 = vsel %vm627_vm5, %v2125_v39, 0  ;;  %v1271_v61 = vand.u32 4294901760, %v1270_v59 }
 0x269   :  { %v2132_v44 = vand.u32 4294901760, %v629_v42  ;;  %572 = vmax.xlane.f32.xlu1 %v571_v41 }
 0x26b   :  { %v2140_v47 = vsub.f32 %v629_v42, %v2132_v44  ;;  %809 = vmatmul.mubr.f32.vlgmr.msra.gmra.mxu1 %v2132_v44 }
 0x26c   :  { %929 = vmatpush1.msra.mxu1 %v2063_v2  ;;  %970 = vmatprep.mubr.f32.mxu1 %v1961_v0 }
 0x26d   :  { %931 = vmatprep.subr.mxu1 %v2065_v3  ;;  %v704_v49 = vand.u32 4294901760, %v2140_v47 }
 0x26e   :  { %933 = vmatpush1.msra.mxu1 %v2067_v7 }
 0x26f   :  { %935 = vmatprep.subr.mxu1 %v2069_v8  ;;  %v705_v52 = vsub.f32 %v2140_v47, %v704_v49 }
 0x270   :  { %937 = vmatpush1.msra.mxu1 %v2071_v9 }
 0x271   :  { %974 = vmatmul.mubr.f32.vlgmr.msra.gmra.mxu1 %v704_v49  ;;  %1097 = vmatprep.subr.mxu1 %v2061_v1  ;;  %v706_v54 = vand.u32 4294901760, %v705_v52 }
 0x272   :  { %1099 = vmatpush1.msra.mxu1 %v2063_v2  ;;  %1140 = vmatprep.mubr.f32.mxu1 %v1961_v0 }
 0x273   :  { %1101 = vmatprep.subr.mxu1 %v2065_v3  ;;  %707 = vmatmul.mubr.f32.vlgmr.msra.gmra.mxu0 %v706_v54 }
 0x274   :  { %846 = vmatpush1.msra.mxu0 %v2077_v11  ;;  %1103 = vmatpush1.msra.mxu1 %v2067_v7 }
 0x275   :  { %849 = vmatprep.subr.mxu0 %v2080_v12  ;;  %1105 = vmatprep.subr.mxu1 %v2069_v8  ;;  %v586_v8 = vadd.s32 %v585_v5, %v584_v4 }
 0x276   :  { %852 = vmatpush1.msra.mxu0 %v2084_v13  ;;  %1107 = vmatpush1.msra.mxu1 %v2071_v9 }
 0x277   :  { %855 = vmatprep.subr.mxu0 %v2087_v14  ;;  %1142 = vmatmul.mubr.f32.vlgmr.msra.gmra.mxu1 %v2132_v44  ;;  %v587_v11 = vsub.s32 47, %v586_v8 }
 0x278   :  { %1783 = vmatprep.subr.mxu1 %v1961_v0  ;;  %858 = vmatpush1.msra.mxu0 %v2090_v15 }
 0x279   :  { %891 = vmatprep.mubr.f32.mxu0 %v1961_v0  ;;  %1784 = vmatpush3.msra.mxu1 %v1257_v58 }
 0x27a   :  { %894 = vmatmul.mubr.f32.vlgmr.msra.gmra.mxu0 %v2140_v47  ;;  %1009 = vmatprep.subr.mxu0 %v741_v16 }
 0x27b   :  { %1785 = vmatprep.subr.mxu1 %v1961_v0  ;;  %1013 = vmatpush1.msra.mxu0 %v747_v17 }
 0x27c   :  { %1786 = vmatpush3.msra.mxu1 %v1264_v60  ;;  %1017 = vmatprep.subr.mxu0 %v753_v18 }
 0x27d   :  { %1787 = vmatprep.subr.mxu1 %v1961_v0  ;;  %1021 = vmatpush1.msra.mxu0 %v759_v19 }
 0x27e   :  { %1788 = vmatpush3.msra.mxu1 %v1271_v61  ;;  %1789 = vmatprep.mubr.msk.f32.mxu1 %vm1962_vm0, %v1961_v0 }
 0x27f   :  { %1025 = vmatprep.subr.mxu0 %v765_v20  ;;  %1790 = vmatmul.mubr.f32.vlgmr.msra.gmra.mxu1 %v2132_v44 }
 0x280   :  { %1801 = vmatprep.subr.mxu1 %v1961_v0  ;;  %1029 = vmatpush1.msra.mxu0 %v771_v21 }
 0x281   :  { %1062 = vmatprep.mubr.f32.mxu0 %v1961_v0  ;;  %1802 = vmatpush3.msra.mxu1 %v2123_v37 }
 0x282   :  { %1064 = vmatmul.mubr.f32.vlgmr.msra.gmra.mxu0 %v2132_v44  ;;  %1774 = vmatprep.subr.mxu0 %v1961_v0 }
 0x283   :  { %1803 = vmatprep.subr.mxu1 %v1961_v0  ;;  %1775 = vmatpush3.msra.mxu0 %v2123_v37 }
 0x284   :  { %1804 = vmatpush3.msra.mxu1 %v2130_v43  ;;  %1776 = vmatprep.subr.mxu0 %v1961_v0 }
 0x285   :  { %1805 = vmatprep.subr.mxu1 %v1961_v0  ;;  %1777 = vmatpush3.msra.mxu0 %v2130_v43 }
 0x286   :  { %1806 = vmatpush3.msra.mxu1 %v2137_v46  ;;  %1807 = vmatprep.mubr.msk.f32.mxu1 %vm1962_vm0, %v1961_v0 }
 0x287   :  { %1778 = vmatprep.subr.mxu0 %v1961_v0  ;;  %1808 = vmatmul.mubr.f32.vlgmr.msra.gmra.mxu1 %v704_v49 }
 0x288   :  { %1819 = vmatprep.subr.mxu1 %v1961_v0  ;;  %1779 = vmatpush3.msra.mxu0 %v2137_v46 }
 0x289   :  { %1780 = vmatprep.mubr.msk.f32.mxu0 %vm1962_vm0, %v1961_v0  ;;  %1820 = vmatpush3.msra.mxu1 %v2123_v37 }
 0x28a   :  { %1781 = vmatmul.mubr.f32.vlgmr.msra.gmra.mxu0 %v706_v54  ;;  %1792 = vmatprep.subr.mxu0 %v1961_v0 }
 0x28b   :  { %1821 = vmatprep.subr.mxu1 %v1961_v0  ;;  %1793 = vmatpush3.msra.mxu0 %v2135_v45 }
 0x28c   :  { %1822 = vmatpush3.msra.mxu1 %v2130_v43  ;;  %1794 = vmatprep.subr.mxu0 %v1961_v0  ;;  %v1963_v43 = vmov 1983009808  }
 0x28d   :  { %1823 = vmatprep.subr.mxu1 %v1961_v0  ;;  %1795 = vmatpush3.msra.mxu0 %v2146_v48 }
 0x28e   :  { %1824 = vmatpush3.msra.mxu1 %v2137_v46  ;;  %1825 = vmatprep.mubr.msk.f32.mxu1 %vm1962_vm0, %v1961_v0 }
 0x28f   :  { %1796 = vmatprep.subr.mxu0 %v1961_v0  ;;  %1826 = vmatmul.mubr.f32.vlgmr.msra.gmra.mxu1 %v2132_v44 }
 0x290   :  { %1797 = vmatpush3.msra.mxu0 %v2153_v51  ;;  %1798 = vmatprep.mubr.msk.f32.mxu0 %vm1962_vm0, %v1961_v0 }
 0x291   :  { %1799 = vmatmul.mubr.f32.vlgmr.msra.gmra.mxu0 %v2140_v47  ;;  %1810 = vmatprep.subr.mxu0 %v1961_v0 }
 0x292   :  { %1811 = vmatpush3.msra.mxu0 %v1255_v50  ;;  %1816 = vmatprep.mubr.msk.f32.mxu0 %vm1962_vm0, %v1961_v0 }
 0x293   :  { %1812 = vmatprep.subr.mxu0 %v1961_v0 }
 0x294   :  { %1813 = vmatpush3.msra.mxu0 %v1262_v53 }
 0x295   :  { %1814 = vmatprep.subr.mxu0 %v1961_v0 }
 0x296   :  { %1815 = vmatpush3.msra.mxu0 %v1269_v56 }
 0x297   :  { %1817 = vmatmul.mubr.f32.vlgmr.msra.gmra.mxu0 %v2132_v44  ;;  %v1625_v44 = vunpack.c.l.s4 %v1963_v43 }
 0x299   :  { %v1626_v51 = vunpack.c.0.s8 %v1625_v44 }
 0x29b   :  { %v1629_v57 = vsub.s32 %v1626_v51, %v582_v63 }
 0x2f2   :  { %v573_v1 = vpop.xlane.xlu1 %572 }
 0x2f3   :  { %v574_v2 = vsel %vm537_vm1, %v573_v1, -inf }
 0x2f4   :  { %v575_v3 = vrot.slane %v574_v2, 4 }
 0x2f6   :  { %v576_v6 = vmax.f32 %v574_v2, %v575_v3 }
 0x2f8   :  { %v577_v7 = vrot.slane %v576_v6, 2 }
 0x2fa   :  { %v578_v9 = vmax.f32 %v576_v6, %v577_v7 }
 0x2fc   :  { %v579_v10 = vrot.slane %v578_v9, 1 }
 0x2fe   :  { %v580_v0 = vmax.f32 %v578_v9, %v579_v10 }
 0x300   :  { %vm588_vm6 = vcmp.eq.f32.partialorder %v2125_v39, %v580_v0 }
 0x301   :  { %v589_v12 = vsel %vm588_vm6, %v587_v11, 4294967295 }
 0x302   :  { %v590_v13 = vsel %vm559_vm3, %v589_v12, 2147483648 }
 0x303   :  { %v592_v14 = vshra.s32 %v590_v13, 16  ;;  %v591_v1 = vand.u32 65535, %v590_v13 }
 0x305   :  { %v594_v15 = vcvt.s32.f32 %v592_v14  ;;  %v593_v3 = vcvt.s32.f32 %v591_v1 }
 0x307   :  { %595 = vmax.xlane.f32.xlu0 %v594_v15 }
 0x32b   :  { %v810_v16 = vpop.f32.mrf.mxu1 }
 0x32d   :  { %v812_v17 = vpop.f32.mrf.mxu1 }
 0x331   :  { %v975_v18 = vpop.f32.mrf.mxu1 }
 0x333   :  { %v708_v19 = vpop.f32.mrf.mxu0  ;;  %v977_v20 = vpop.f32.mrf.mxu1 }
 0x334   :  { %v811_v33 = vadd.f32 %v810_v16, %v708_v19 }
 0x335   :  { %v710_v22 = vpop.f32.mrf.mxu0 }
 0x336   :  { %v813_v30 = vadd.f32 %v812_v17, %v710_v22 }
 0x337   :  { %v1143_v21 = vpop.f32.mrf.mxu1 }
 0x339   :  { %v1145_v23 = vpop.f32.mrf.mxu1 }
 0x33a   :  { %v895_v24 = vpop.f32.mrf.mxu0 }
 0x33b   :  { %v896_v36 = vadd.f32 %v895_v24, %v811_v33 }
 0x33c   :  { %v897_v27 = vpop.f32.mrf.mxu0 }
 0x33d   :  { %v898_v34 = vadd.f32 %v897_v27, %v813_v30  ;;  %v976_v40 = vadd.f32 %v975_v18, %v896_v36 }
 0x33f   :  { %v1308_v25 = vpop.f32.mrf.mxu1  ;;  %v978_v38 = vadd.f32 %v977_v20, %v898_v34 }
 0x341   :  { %v1791_v26 = vpop.f32.mrf.mxu1 }
 0x342   :  { %v1065_v28 = vpop.f32.mrf.mxu0 }
 0x343   :  { %v1066_v47 = vadd.f32 %v1065_v28, %v976_v40 }
 0x344   :  { %v1067_v31 = vpop.f32.mrf.mxu0 }
 0x345   :  { %v1068_v41 = vadd.f32 %v1067_v31, %v978_v38  ;;  %v1144_v52 = vadd.f32 %v1143_v21, %v1066_v47 }
 0x347   :  { %v1462_v29 = vpop.f32.mrf.mxu1  ;;  %v1146_v50 = vadd.f32 %v1145_v23, %v1068_v41 }
 0x349   :  { %v1809_v32 = vpop.f32.mrf.mxu1  ;;  %v1623_v55 = vcombine.low %v1144_v52, %v1146_v50 }
 0x34a   :  { %v1222_v35 = vpop.f32.mrf.mxu0 }
 0x34b   :  { %v1309_v42 = vadd.f32 %v1308_v25, %v1222_v35  ;;  %v1630_v61 = vrot.slane %v1623_v55, %v1629_v57 }
 0x34c   :  { %v1782_v37 = vpop.f32.mrf.mxu0 }
 0x34f   :  { %v1616_v39 = vpop.f32.mrf.mxu1 }
 0x351   :  { %v1386_v45 = vpop.f32.mrf.mxu0  ;;  %v1827_v46 = vpop.f32.mrf.mxu1 }
 0x352   :  { %v1387_v48 = vadd.f32 %v1386_v45, %v1309_v42 }
 0x353   :  { %v1800_v49 = vpop.f32.mrf.mxu0 }
 0x354   :  { %v1463_v53 = vadd.f32 %v1462_v29, %v1387_v48 }
 0x357   :  { %v1542_v54 = vpop.f32.mrf.mxu0 }
 0x358   :  { %v1543_v56 = vadd.f32 %v1542_v54, %v1463_v53 }
 0x359   :  { %v1818_v58 = vpop.f32.mrf.mxu0 }
 0x35a   :  { %v1617_v59 = vadd.f32 %v1616_v39, %v1543_v56 }
 0x35c   :  { %v1637_v60 = vrot.slane %v1617_v59, %v1629_v57 }
 0x35e   :  { %v1638_v62 = vcombine.low %v1630_v61, %v1637_v60 }
 0x360   :  { %1640 = vst [vmem:[#allocation8] sm:$0x3f] %v1638_v62 }
 0x390   :  { %v596_v2 = vpop.xlane.xlu0 %595 }
 0x391   :  { %vm597_vm7 = vcmp.eq.f32.partialorder %v594_v15, %v596_v2 }
 0x392   :  { %v598_v4 = vsel %vm597_vm7, %v593_v3, -inf }
 0x393   :  { %599 = vmax.xlane.f32.xlu1 %v598_v4 }
 0x394   :  { %1917 = shalt.err (!%p1914_p5)
}
 0x395   :  { %1650 = dma.vmem_to_hbm [thread:$0]  %s1648_s11, 96, %s2264_s4, [#allocation4]   ;;  %v602_v63 = vcvt.f32.s32 %v596_v2  ;;  %vm616_vm11 = vcmask 0  }
 0x396   :  { %s1965_s15 = smov [#allocation9]  }
 0x397   :  { %v603_v6 = vshll.u32 %v602_v63, 16  ;;  %s1657_s16 = sshll.u32 %s1965_s15, 4  ;;  %s1658_s16 = int_to_ptr.vmem [resolvable:$true] %s1657_s16 }
 0x398   :  { %s1926_s4 = scalar_lea.vmem %s1658_s16, 16  ;;  %s1930_s17 = scalar_lea.vmem %s1658_s16, 32 }
 0x399   :  { %p1927_p6 = scmp.ne.s32.totalorder %s1658_s16, %s1926_s4  ;;  %p1931_p7 = scmp.lt.s32.totalorder %s1658_s16, %s1658_s16 }
 0x39a   :  { %p1932_p8 = scmp.lt.s32.totalorder %s1930_s17, %s1926_s4 }
 0x39c   :  { %p1933_p9 = por %p1932_p8, %p1931_p7 }
 0x39e   :  { %p1934_p10 = pnand %p1933_p9, %p1927_p6 }
 0x41c   :  { %v600_v5 = vpop.xlane.xlu1 %599 }
 0x41d   :  { %v601_v7 = vcvt.f32.s32 %v600_v5 }
 0x41f   :  { %v604_v8 = vadd.s32 %v603_v6, %v601_v7 }
 0x421   :  { %v605_v9 = vsel %vm537_vm1, %v604_v8, 2147483648 }
 0x422   :  { %v606_v10 = vrot.slane %v605_v9, 4 }
 0x424   :  { %vm607_vm8 = vcmp.gt.s32.totalorder %v605_v9, %v606_v10 }
 0x425   :  { %v608_v11 = vsel %vm607_vm8, %v605_v9, %v606_v10 }
 0x426   :  { %v609_v0 = vrot.slane %v608_v11, 2 }
 0x428   :  { %vm610_vm9 = vcmp.gt.s32.totalorder %v608_v11, %v609_v0 }
 0x429   :  { %v611_v12 = vsel %vm610_vm9, %v608_v11, %v609_v0 }
 0x42a   :  { %v612_v13 = vrot.slane %v611_v12, 1 }
 0x42c   :  { %vm613_vm10 = vcmp.gt.s32.totalorder %v611_v12, %v612_v13 }
 0x42d   :  { %v614_v14 = vsel %vm613_vm10, %v611_v12, %v612_v13 }
 0x42e   :  { %v615_v15 = vsub.s32 47, %v614_v14 }
 0x430   :  { %617 = vst.msk [vmem:[#allocation9] sm:$0x1] %vm616_vm11, %v615_v15 }
 0x431   :  { %1937 = shalt.err (!%p1934_p10)
}
 0x432   :  { %1660 = dma.vmem_to_hbm [thread:$0]  %s1658_s16, 16, %s2265_s5, [#allocation10]  }
 0x433   :  { %1950 = dma.done.wait [#allocation4], 96  }
 0x434   :  { %1951 = vsyncadd [#allocation4], 4294967200 }
 0x435   :  { %1952 = dma.done.wait [#allocation10], 16  }
 0x436   :  { %1953 = vsyncadd [#allocation10], 4294967280 }
 0x437   :  { %1667 = vsyncpa [#allocation3], 1 }
 0x438   :  { %1668 = vsyncpa [#allocation6], 1 }
 0x439   :  { %1669 = vsyncpa [#allocation4], 1 }
 0x43a   :  { %1670 = vsyncpa [#allocation10], 1 }

</bundles_post_ra>
